<compile_context>
chip_gen: v6e
topology: v6e:2x2x1
jax: 0.10.0
libtpu: 0.0.40
codegen_flags: <defaults>
</compile_context>

<pallas_src>
import functools

import jax
import jax.numpy as jnp
from jax.experimental import pallas as pl
from jax.experimental.pallas import tpu as pltpu


def _round_up(x, m):
    return ((x + m - 1) // m) * m


# -----------------------------------------------------------------------------
# Fused Pallas kernel: conv(all windows) + bias + ReLU + masked running max
# Grid = (col_tiles ["parallel"], row_tiles ["arbitrary" / reduction]).
# -----------------------------------------------------------------------------
def _fused_conv_relu_dmax_kernel(x_ref, w_ref, b_ref, vlen_ref, o_ref):
    i = pl.program_id(1)  # row-tile index (reduction axis, last in grid)

    # bf16 x bf16 -> f32 MXU accumulation, f32 bias + ReLU.
    acc = jnp.dot(x_ref[...], w_ref[...], preferred_element_type=jnp.float32)
    acc = jnp.maximum(acc + b_ref[...], 0.0)

    # Row-validity mask: row t contributes to column j iff t < vlen[j]
    # (vlen[j] = sizes - window_size(j) + 1; padded columns use vlen = sizes).
    tile_rows = x_ref.shape[0]
    rows = i * tile_rows + jax.lax.broadcasted_iota(jnp.int32, (tile_rows, 1), 0)
    valid = rows < vlen_ref[...]
    tile_max = jnp.max(jnp.where(valid, acc, -jnp.inf), axis=0, keepdims=True)

    # Running max accumulated in the resident output block.
    @pl.when(i == 0)
    def _init():
        o_ref[...] = tile_max

    @pl.when(i > 0)
    def _update():
        o_ref[...] = jnp.maximum(o_ref[...], tile_max)


def fused_conv_relu_dmax(x_unf, w_fused, b_fused, vlen, tile_rows):
    """x_unf: (M_pad, K_dim) bf16 im2col (K unpadded, rows zero-padded).
    w_fused: (K_dim, N_pad) bf16.  b_fused/vlen: (1, N_pad) f32/int32.
    Returns (1, N_pad) f32 per-column DMax of relu(conv)."""
    m_pad, k_dim = x_unf.shape
    _, n_pad = w_fused.shape
    n_row = m_pad // tile_rows

    # >= 2 parallel column tiles when possible so v7x's two TensorCores both run.
    n_col = 2 if (n_pad >= 256 and n_pad % 256 == 0) else 1
    col_tile = n_pad // n_col

    flops = 2 * m_pad * k_dim * n_pad
    bytes_accessed = (2 * (m_pad * k_dim * n_col + k_dim * n_pad)
                      + 4 * (3 * n_pad))

    return pl.pallas_call(
        _fused_conv_relu_dmax_kernel,
        out_shape=jax.ShapeDtypeStruct((1, n_pad), jnp.float32),
        grid_spec=pl.GridSpec(
            grid=(n_col, n_row),
            in_specs=[
                pl.BlockSpec((tile_rows, k_dim), lambda j, i: (i, 0)),  # x tiles
                pl.BlockSpec((k_dim, col_tile), lambda j, i: (0, j)),   # weights
                pl.BlockSpec((1, col_tile), lambda j, i: (0, j)),       # bias
                pl.BlockSpec((1, col_tile), lambda j, i: (0, j)),       # valid len
            ],
            out_specs=pl.BlockSpec((1, col_tile), lambda j, i: (0, j)),
        ),
        compiler_params=pltpu.CompilerParams(
            dimension_semantics=("parallel", "arbitrary"),
        ),
        cost_estimate=pl.CostEstimate(
            flops=flops, transcendentals=0, bytes_accessed=bytes_accessed),
    )(x_unf, w_fused, b_fused, vlen)


# -----------------------------------------------------------------------------
# Parameter packing (hoisted into __init__, done once)
# -----------------------------------------------------------------------------
def _pack_fused_conv_params(conv_params, window_sizes, cov_dim, mem_dim):
    """All windows' conv weights -> one (K_max*C_in, N_pad) bf16 matrix.

    Row order is tap-major [k * cov_dim + c]; window w occupies output columns
    [w*mem_dim, (w+1)*mem_dim) with rows for taps >= window_size zeroed.
    Also builds the per-column DMax offset (window_size - 1; 0 for pad cols).
    """
    k_max = max(window_sizes)
    k_dim = k_max * cov_dim
    n = len(window_sizes) * mem_dim
    n_pad = _round_up(n, 128)

    w_full = jnp.zeros((k_dim, n_pad), jnp.float32)
    b_full = jnp.zeros((1, n_pad), jnp.float32)
    col_off = jnp.zeros((1, n_pad), jnp.int32)
    for idx, ((w, b), ws) in enumerate(zip(conv_params, window_sizes)):
        # (mem_dim, cov_dim, ws) -> (ws*cov_dim, mem_dim), row = k*cov_dim + c
        w2 = jnp.transpose(w, (2, 1, 0)).reshape(ws * cov_dim, mem_dim)
        c0 = idx * mem_dim
        w_full = w_full.at[: ws * cov_dim, c0:c0 + mem_dim].set(w2)
        b_full = b_full.at[0, c0:c0 + mem_dim].set(b)
        col_off = col_off.at[0, c0:c0 + mem_dim].set(ws - 1)
    return w_full.astype(jnp.bfloat16), b_full, col_off, n_pad


def _pack_linear_params(weight, bias, n_pad):
    """PyTorch Linear weight (out, in) -> (N_pad, out) with zero rows for the
    padded max columns, so the padded (1, N_pad) pool needs no slicing."""
    out_f, in_f = weight.shape
    w_p = jnp.zeros((n_pad, out_f), jnp.float32).at[:in_f, :].set(weight.T)
    return w_p, bias


def _row_tiling(m, tile_rows):
    m16 = _round_up(m, 16)           # bf16 sublane granularity
    if m16 <= tile_rows:
        return m16, m16
    return _round_up(m, tile_rows), tile_rows


# -----------------------------------------------------------------------------
# Full module
# -----------------------------------------------------------------------------
class NewConvModule:
    """JAX/Pallas mirror of the PyTorch NewConvModule forward pass."""

    def __init__(self, window_sizes, cov_dim, mem_dim, key, tile_rows=512):
        assert tile_rows % 16 == 0
        self.window_sizes = tuple(window_sizes)
        self.cov_dim = cov_dim
        self.mem_dim = mem_dim
        self.tile_rows = tile_rows
        self.k_max = max(self.window_sizes)

        n_ws = len(self.window_sizes)
        keys = jax.random.split(key, 2 * n_ws + 2)

        self.conv_params = []   # raw (weight, bias) for the pure-JAX reference
        for i, ws in enumerate(self.window_sizes):
            fan_in = cov_dim * ws
            bound = 1.0 / (fan_in ** 0.5)
            w = jax.random.uniform(keys[2 * i], (mem_dim, cov_dim, ws),
                                   jnp.float32, -bound, bound)
            b = jax.random.uniform(keys[2 * i + 1], (mem_dim,),
                                   jnp.float32, -bound, bound)
            self.conv_params.append((w, b))

        # Fused, padded, bf16 conv weights + bias + per-column DMax offsets.
        (self.w_fused, self.b_fused,
         self.col_offset, self.n_pad) = _pack_fused_conv_params(
            self.conv_params, self.window_sizes, cov_dim, mem_dim)

        lin_in = n_ws * mem_dim
        bound = 1.0 / (lin_in ** 0.5)
        self.lin_w = jax.random.uniform(keys[-2], (mem_dim, lin_in),
                                        jnp.float32, -bound, bound)
        self.lin_b = jax.random.uniform(keys[-1], (mem_dim,),
                                        jnp.float32, -bound, bound)
        self.lin_w_packed, _ = _pack_linear_params(self.lin_w, self.lin_b,
                                                   self.n_pad)

    def __call__(self, x, sizes):
        """x: (L, cov_dim), sizes: valid sequence length  ->  (1, mem_dim)."""
        l = x.shape[0]
        k_max = self.k_max
        m_pad, tile = _row_tiling(l, self.tile_rows)

        # im2col at K_max (K axis left unpadded -> full-array block dim).
        x_bf = x.astype(jnp.bfloat16)
        x_ext = jnp.pad(x_bf, ((0, m_pad + k_max - 1 - l), (0, 0)))
        if k_max == 1:
            x_unf = x_ext[:m_pad]
        else:
            x_unf = jnp.concatenate(
                [x_ext[k:k + m_pad, :] for k in range(k_max)], axis=1)

        # Per-column valid length: sizes - window_size + 1 (padded cols: sizes).
        # NOTE: if sizes < max(window_sizes) the masked max is -inf, matching
        # the reference semantics (may propagate NaN through the linear).
        vlen = jnp.asarray(sizes, jnp.int32) - self.col_offset

        pool = fused_conv_relu_dmax(x_unf, self.w_fused, self.b_fused,
                                    vlen, tile)              # (1, N_pad) f32

        # Final Linear + Tanh: 1-row GEMV left to XLA (padded cols zero-weighted).
        return jnp.tanh(pool @ self.lin_w_packed + self.lin_b[None, :])


# -----------------------------------------------------------------------------
# Pure-JAX reference (mirrors the kernel's bf16 operand quantization)
# -----------------------------------------------------------------------------
def _reference_forward(model, x, sizes):
    xf = x.astype(jnp.bfloat16).astype(jnp.float32)
    pools = []
    for (w, b), ws in zip(model.conv_params, model.window_sizes):
        l_out = x.shape[0] - ws + 1
        x_unf = jnp.concatenate([xf[k:k + l_out, :] for k in range(ws)], axis=1)
        w2 = jnp.transpose(w, (2, 1, 0)).reshape(ws * model.cov_dim,
                                                 model.mem_dim)
        w2 = w2.astype(jnp.bfloat16).astype(jnp.float32)
        conv = jnp.maximum(x_unf @ w2 + b[None, :], 0.0)
        n_valid = sizes - ws + 1
        mask = jnp.arange(l_out)[:, None] < n_valid
        pools.append(jnp.max(jnp.where(mask, conv, -jnp.inf),
                             axis=0, keepdims=True))
    concat = jnp.concatenate(pools, axis=1)
    return jnp.tanh(concat @ model.lin_w.T + model.lin_b[None, :])


if __name__ == "__main__":
    # Small shapes consistent with the module (real: seq=158, dims=150, ws 1..5).
    # tile_rows=16 so even this tiny case exercises the multi-row-tile running
    # max and the 2-way parallel column split (production default is 512).
    seq_len, cov_dim, mem_dim = 40, 32, 64
    window_sizes = (1, 2, 3)
    sizes = 37

    key = jax.random.PRNGKey(0)
    k_x, k_p = jax.random.split(key)
    x = jax.random.normal(k_x, (seq_len, cov_dim), jnp.float32)

    model = NewConvModule(window_sizes, cov_dim, mem_dim, k_p, tile_rows=16)
    forward = jax.jit(lambda xx, ss: model(xx, ss))

    out = forward(x, sizes)
    out = jax.block_until_ready(out)

    ref = _reference_forward(model, x, sizes)
    assert out.shape == (1, mem_dim)
    err = float(jnp.max(jnp.abs(out - ref)))
    assert jnp.allclose(out, ref, atol=2e-3, rtol=2e-3), err

    print("KERNEL_OK")
</pallas_src>

<mosaic_0001>
module attributes {stable_mosaic.version = 11 : i64} {
  func.func @_fused_conv_relu_dmax_kernel(%arg0: i32, %arg1: i32, %arg2: memref<16x96xbf16, #tpu.memory_space<vmem>>, %arg3: memref<96x128xbf16, #tpu.memory_space<vmem>>, %arg4: memref<1x128xf32, #tpu.memory_space<vmem>>, %arg5: memref<1x128xi32, #tpu.memory_space<vmem>>, %arg6: memref<1x128xf32, #tpu.memory_space<vmem>>) attributes {dimension_semantics = [#tpu.dimension_semantics<parallel>, #tpu.dimension_semantics<arbitrary>], iteration_bounds = array<i64: 2, 3>, scalar_prefetch = 0 : i64, scratch_operands = 0 : i64, tpu.core_type = #tpu.core_type<tc>, window_params = [{transform_indices = @transform_0, window_bounds = array<i64: 16, 96>}, {transform_indices = @transform_1, window_bounds = array<i64: 96, 128>}, {transform_indices = @transform_2, window_bounds = array<i64: 1, 128>}, {transform_indices = @transform_3, window_bounds = array<i64: 1, 128>}, {transform_indices = @transform_4, window_bounds = array<i64: 1, 128>}]} {
    %c0 = arith.constant 0 : index
    %c0_0 = arith.constant 0 : index
    %0 = vector.load %arg2[%c0, %c0_0] : memref<16x96xbf16, #tpu.memory_space<vmem>>, vector<16x96xbf16>
    %c0_1 = arith.constant 0 : index
    %c0_2 = arith.constant 0 : index
    %1 = vector.load %arg3[%c0_1, %c0_2] : memref<96x128xbf16, #tpu.memory_space<vmem>>, vector<96x128xbf16>
    %cst = arith.constant dense<0.000000e+00> : vector<16x128xf32>
    %2 = tpu.matmul %0, %1, %cst {dimension_numbers = #tpu.dot_dimension_numbers<[1], [0], [0], [1], [0, 0, 1, 1], [], []>} : vector<16x96xbf16>, vector<96x128xbf16>, vector<16x128xf32> -> vector<16x128xf32>
    %c0_3 = arith.constant 0 : index
    %c0_4 = arith.constant 0 : index
    %3 = vector.load %arg4[%c0_3, %c0_4] : memref<1x128xf32, #tpu.memory_space<vmem>>, vector<1x128xf32>
    %4 = vector.broadcast %3 : vector<1x128xf32> to vector<16x128xf32>
    %5 = arith.addf %2, %4 : vector<16x128xf32>
    %cst_5 = arith.constant 0.000000e+00 : f32
    %6 = vector.broadcast %cst_5 : f32 to vector<16x128xf32>
    %7 = arith.maximumf %5, %6 : vector<16x128xf32>
    %c16_i32 = arith.constant 16 : i32
    %8 = arith.muli %arg1, %c16_i32 : i32
    %9 = tpu.iota {dimensions = array<i32: 0>} : vector<16x1xi32>
    %10 = vector.broadcast %8 : i32 to vector<16x1xi32>
    %11 = arith.addi %10, %9 : vector<16x1xi32>
    %c0_6 = arith.constant 0 : index
    %c0_7 = arith.constant 0 : index
    %12 = vector.load %arg5[%c0_6, %c0_7] : memref<1x128xi32, #tpu.memory_space<vmem>>, vector<1x128xi32>
    %13 = vector.broadcast %11 : vector<16x1xi32> to vector<16x128xi32>
    %14 = vector.broadcast %12 : vector<1x128xi32> to vector<16x128xi32>
    %15 = arith.cmpi slt, %13, %14 : vector<16x128xi32>
    %cst_8 = arith.constant 0xFF800000 : f32
    %16 = vector.broadcast %cst_8 : f32 to vector<16x128xf32>
    %17 = arith.select %15, %7, %16 : vector<16x128xi1>, vector<16x128xf32>
    %cst_9 = arith.constant dense<0xFF800000> : vector<128xf32>
    %18 = vector.multi_reduction <maximumf>, %17, %cst_9 [0] : vector<16x128xf32> to vector<128xf32>
    %19 = vector.shape_cast %18 : vector<128xf32> to vector<1x128xf32>
    %c0_i32 = arith.constant 0 : i32
    %20 = arith.cmpi eq, %arg1, %c0_i32 : i32
    %21 = arith.extui %20 : i1 to i32
    %c0_i32_10 = arith.constant 0 : i32
    %22 = arith.cmpi ne, %21, %c0_i32_10 : i32
    scf.if %22 {
      %c0_13 = arith.constant 0 : index
      %c0_14 = arith.constant 0 : index
      %26 = vector.load %arg6[%c0_13, %c0_14] : memref<1x128xf32, #tpu.memory_space<vmem>>, vector<1x128xf32>
      tpu.vector_store %arg6[%c0_13, %c0_14], %19 {strides = array<i32>} : memref<1x128xf32, #tpu.memory_space<vmem>>, vector<1x128xf32>,
    } else {
    }
    %c0_i32_11 = arith.constant 0 : i32
    %23 = arith.cmpi sgt, %arg1, %c0_i32_11 : i32
    %24 = arith.extui %23 : i1 to i32
    %c0_i32_12 = arith.constant 0 : i32
    %25 = arith.cmpi ne, %24, %c0_i32_12 : i32
    scf.if %25 {
      %c0_13 = arith.constant 0 : index
      %c0_14 = arith.constant 0 : index
      %26 = vector.load %arg6[%c0_13, %c0_14] : memref<1x128xf32, #tpu.memory_space<vmem>>, vector<1x128xf32>
      %27 = arith.maximumf %26, %19 : vector<1x128xf32>
      %c0_15 = arith.constant 0 : index
      %c0_16 = arith.constant 0 : index
      %28 = vector.load %arg6[%c0_15, %c0_16] : memref<1x128xf32, #tpu.memory_space<vmem>>, vector<1x128xf32>
      tpu.vector_store %arg6[%c0_15, %c0_16], %27 {strides = array<i32>} : memref<1x128xf32, #tpu.memory_space<vmem>>, vector<1x128xf32>,
    } else {
    }
    return
  }
  func.func @transform_0(%arg0: i32, %arg1: i32) -> (i32, i32) {
    %c0_i32 = arith.constant 0 : i32
    %c0_i32_0 = arith.constant 0 : i32
    return %arg1, %c0_i32 : i32, i32
  }
  func.func @transform_1(%arg0: i32, %arg1: i32) -> (i32, i32) {
    %c0_i32 = arith.constant 0 : i32
    %c0_i32_0 = arith.constant 0 : i32
    return %c0_i32, %arg0 : i32, i32
  }
  func.func @transform_2(%arg0: i32, %arg1: i32) -> (i32, i32) {
    %c0_i32 = arith.constant 0 : i32
    %c0_i32_0 = arith.constant 0 : i32
    return %c0_i32, %arg0 : i32, i32
  }
  func.func @transform_3(%arg0: i32, %arg1: i32) -> (i32, i32) {
    %c0_i32 = arith.constant 0 : i32
    %c0_i32_0 = arith.constant 0 : i32
    return %c0_i32, %arg0 : i32, i32
  }
  func.func @transform_4(%arg0: i32, %arg1: i32) -> (i32, i32) {
    %c0_i32 = arith.constant 0 : i32
    %c0_i32_0 = arith.constant 0 : i32
    return %c0_i32, %arg0 : i32, i32
  }
}

</mosaic_0001>

<bundles_post_ra>
// kernel: _lambda_.1
= control target key start
LH: loop header
LB: loop body
LE: loop exit
PB: predicated region body
PF: predicated region fallthrough
CT: control target
= control target key end

     0   :  { %s778_s15 = smov 0   ;;  %s780_s16 = smov 0   ;;  %s887_s0 = inlined_call_operand.vmem [shape: bf16[48,96], index: 0, kind: input, shape index: {}]   ;;  %s888_s1 = inlined_call_operand.vmem [shape: bf16[96,256], index: 1, kind: input, shape index: {}]   ;;  %s889_s2 = inlined_call_operand.vmem [shape: f32[1,256], index: 2, kind: input, shape index: {}]   ;;  %s890_s3 = inlined_call_operand.vmem [shape: s32[1,256], index: 3, kind: input, shape index: {}]   ;;  %s891_s4 = inlined_call_operand.vmem [shape: f32[1,256], index: 4, kind: output, shape index: {}]  }
   0x1   :  { %s782_s17 = smov 0   ;;  %s784_s18 = smov 0  }
   0x2   :  { %s786_s19 = smov 0   ;;  %s788_s20 = smov 0  }
   0x3   :  { %s790_s21 = smov 0  }
   0x4 LB: > { %s23_s22 = sadd.s32 1, %s741_s19  ;;  %s26_s23 = sadd.s32 1, %s745_s20  ;;  %s749_s21 = sphi %s790_s21, %s14_s21   ;;  %s745_s20 = sphi %s788_s20, %s897_s20   ;;  %s741_s19 = sphi %s786_s19, %s896_s19   ;;  %s737_s18 = sphi %s784_s18, %s895_s18   ;;  %s733_s17 = sphi %s782_s17, %s894_s17   ;;  %s729_s16 = sphi %s780_s16, %s893_s16   ;;  %s725_s15 = sphi %s778_s15, %s892_s15  }
   0x5   : > { %p24_p0 = scmp.ge.s32.totalorder %s23_s22, 3  ;;  %p66_p1 = scmp.ne.s32.totalorder %s729_s16, %s725_s15 }
   0x6   : > { %p67_p2 = scmp.eq.s32.totalorder %s749_s21, 0  ;;  %s59_s25 = sadd.s32 1, %s729_s16 }
   0x7   : > { %s899_s22 = smov (%p24_p0, %s23_s22), 0  ;;  %s901_s23 = smov (!%p24_p0, %s26_s23), %s745_s20 }
   0x8   : > { %p68_p3 = por %p67_p2, %p66_p1  ;;  %p28_p4 = scmp.ge.s32.totalorder %s901_s23, 2 }
   0x9   : > { %p585_p6 = scmp.ge.s32.totalorder %s749_s21, 6 }
   0xa   : > { %s903_s23 = smov (%p28_p4, %s901_s23), 0 }
   0xb   : > { %s56_s24 = ssub.s32 %s745_s20, %s903_s23  ;;  %170 = sbr.rel (%p585_p6) target bundleno = 28 (0x1c), region = 16 }
   0xc   : > { %p57_p5 = scmp.eq.s32.totalorder %s56_s24, 0 }
   0xe   : > { %s827_s26 = scalar_select %p57_p5, %s729_s16, %s59_s25  }
  0x10   : > { %182 = sbr.rel (!%p68_p3) target bundleno = 28 (0x1c), region = 24  ;;  %s184_s27 = sand.u32 (%p68_p3), 1, %s729_s16  }
  0x11   : > { %s586_s28 = sshll.u32 (%p68_p3), %s745_s20, 2  ;;  %s628_s29 = smul.u32 (%p68_p3), 48, %s184_s27 }
  0x12   : > { %s188_s6 = scalar_lea.vmem (%p68_p3), %s888_s1, %s586_s28 }
  0x13   : > { %v205_v0 = vld [vmem:[%s188_s6] sm:$0xf] (%p68_p3)  ;;  %v207_v1 = vld [vmem:[%s188_s6 + $0x8] sm:$0xf] (%p68_p3)  ;;  %v209_v2 = vld [vmem:[%s188_s6 + $0x10] sm:$0xf] (%p68_p3) }
  0x14   : > { %v211_v3 = vld [vmem:[%s188_s6 + $0x18] sm:$0xf] (%p68_p3)  ;;  %v213_v4 = vld [vmem:[%s188_s6 + $0x20] sm:$0xf] (%p68_p3)  ;;  %s186_s7 = scalar_lea.vmem (%p68_p3), [#allocation2], %s628_s29 }
  0x15   : > { %206 = vst [vmem:[%s186_s7] sm:$0xf] %v205_v0  ;;  %208 = vst [vmem:[%s186_s7 + $0x4] sm:$0xf] %v207_v1  ;;  %v215_v5 = vld [vmem:[%s188_s6 + $0x28] sm:$0xf] }
  0x16   : > { %210 = vst [vmem:[%s186_s7 + $0x8] sm:$0xf] %v209_v2  ;;  %212 = vst [vmem:[%s186_s7 + $0xc] sm:$0xf] %v211_v3  ;;  %v217_v6 = vld [vmem:[%s188_s6 + $0x30] sm:$0xf] }
  0x17   : > { %214 = vst [vmem:[%s186_s7 + $0x10] sm:$0xf] %v213_v4  ;;  %v219_v7 = vld [vmem:[%s188_s6 + $0x38] sm:$0xf]  ;;  %216 = vst [vmem:[%s186_s7 + $0x14] sm:$0xf] %v215_v5 }
  0x18   : > { %218 = vst [vmem:[%s186_s7 + $0x18] sm:$0xf] %v217_v6  ;;  %220 = vst [vmem:[%s186_s7 + $0x1c] sm:$0xf] %v219_v7  ;;  %v221_v8 = vld [vmem:[%s188_s6 + $0x40] sm:$0xf] }
  0x19   : > { %v223_v9 = vld [vmem:[%s188_s6 + $0x48] sm:$0xf]  ;;  %v225_v10 = vld [vmem:[%s188_s6 + $0x50] sm:$0xf]  ;;  %222 = vst [vmem:[%s186_s7 + $0x20] sm:$0xf] %v221_v8 }
  0x1a   : > { %224 = vst [vmem:[%s186_s7 + $0x24] sm:$0xf] %v223_v9  ;;  %226 = vst [vmem:[%s186_s7 + $0x28] sm:$0xf] %v225_v10  ;;  %v227_v11 = vld [vmem:[%s188_s6 + $0x58] sm:$0xf] }
  0x1b   : > { %228 = vst [vmem:[%s186_s7 + $0x2c] sm:$0xf] %v227_v11 }
  0x1c PF: > { %p587_p7 = scmp.ge.s32.totalorder %s749_s21, 1  ;;  %p287_p8 = scmp.lt.s32.totalorder %s749_s21, 7 }
  0x1e   : > { %p288_p9 = pnand %p587_p7, %p287_p8 }
  0x1f   : > { %s294_s8 = sand.u32 (!%p288_p9), 1, %s725_s15   ;;  %s588_s9 = sshll.u32 (!%p288_p9), %s733_s17, 1 }
  0x20   : > { %291 = sbr.rel (%p288_p9) target bundleno = 290 (0x122), region = 73  ;;  %p329_p10 = scmp.lt.s32.totalorder (!%p288_p9), %s588_s9, 5 }
  0x21   : > { %s629_s10 = smul.u32 (!%p288_p9), 48, %s294_s8  ;;  %p334_p11 = scmp.lt.s32.totalorder (!%p288_p9), %s737_s18, 1 }
  0x22   : > { %s599_s5 = sshll.u32 (!%p288_p9), %s733_s17, 4  ;;  %p601_p12 = scmp.ne.s32.totalorder (!%p288_p9), %s733_s17, 0 }
  0x23   : > { %s296_s11 = scalar_lea.vmem (!%p288_p9), [#allocation2], %s629_s10 }
  0x25   : > { %v751_v12 = vmov 0.0   ;;  %vm752_vm0 = vmmov 0   ;;  %v688_v13 = vld [vmem:[%s296_s11 + $0x28] sm:$0xff]   ;;  %s905_s9 = smov (!%p329_p10, %s588_s9), 5  ;;  %s907_s18 = smov (!%p334_p11, %s737_s18), 1  ;;  %v689_v14 = vld [vmem:[%s296_s11 + $0x20] sm:$0xff]   ;;  %v454_v20 = vlaneseq  ;;  %v457_v24 = vstv %s599_s5 }
  0x26   : > { %612 = vmatprep.subr.bf16.mxu0 %v751_v12  ;;  %624 = vmatprep.mubr.msk.bf16.mxu0 %vm752_vm0, %v751_v12  ;;  %s589_s12 = sshll.u32 %s905_s9, 2  ;;  %s847_s15 = scalar_lea.vmem %s891_s4, %s907_s18  ;;  %v690_v15 = vld [vmem:[%s296_s11 + $0x18] sm:$0xff]   ;;  %v691_v16 = vld [vmem:[%s296_s11 + $0x10] sm:$0xff]   ;;  %v692_v17 = vld [vmem:[%s296_s11 + $0x8] sm:$0xff]   ;;  %vm406_vm1 = vcmask 785408  }
  0x27   : > { %613 = vmatpush3.bf16.msra.mxu0 %v688_v13  ;;  %s332_s27 = scalar_lea.vmem %s887_s0, %s589_s12  ;;  %v693_v18 = vld [vmem:[%s296_s11] sm:$0xff]   ;;  %s336_s30 = scalar_lea.vmem %s889_s2, %s907_s18  ;;  %v455_v21 = vshrl.u32 %v454_v20, 7 }
  0x28   : > { %614 = vmatprep.subr.bf16.mxu0 %v751_v12  ;;  %v694_v19 = vld [vmem:[%s332_s27] sm:$0xff]   ;;  %s339_s8 = scalar_lea.vmem %s890_s3, %s907_s18 }
  0x29   : > { %v590_v22 = vld [vmem:[%s336_s30] ss:$0 sm:$0xff]  ;;  %v456_v23 = vadd.s32 8, %v455_v21  ;;  %v458_v27 = vadd.s32 %v457_v24, %v455_v21 }
  0x2a   : > { %v600_v30 = vld [vmem:[%s339_s8] ss:$0 sm:$0xff] }
  0x2b   : > { %615 = vmatpush3.bf16.msra.mxu0 %v689_v14  ;;  %v459_v29 = vadd.s32 %v457_v24, %v456_v23  ;;  %vm465_vm2 = vcmp.lt.s32.totalorder %v458_v27, %v600_v30 }
  0x2c   : > { %616 = vmatprep.subr.bf16.mxu0 %v751_v12 }
  0x2d   : > { %vm466_vm3 = vcmp.lt.s32.totalorder %v459_v29, %v600_v30 }
  0x2f   : > { %617 = vmatpush3.bf16.msra.mxu0 %v690_v15 }
  0x30   : > { %618 = vmatprep.subr.bf16.mxu0 %v751_v12 }
  0x33   : > { %619 = vmatpush3.bf16.msra.mxu0 %v691_v16 }
  0x34   : > { %620 = vmatprep.subr.bf16.mxu0 %v751_v12 }
  0x37   : > { %621 = vmatpush3.bf16.msra.mxu0 %v692_v17 }
  0x38   : > { %622 = vmatprep.subr.bf16.mxu0 %v751_v12 }
  0x3b   : > { %623 = vmatpush3.bf16.msra.mxu0 %v693_v18 }
  0x3e   : > { %625 = vmatmul.mubr.msk.bf16.vlgmr.msra.gmra.mxu0 %vm406_vm1, %v694_v19 }
  0xfe   : > { %v444_v25 = vpop.f32.mrf.mxu0 }
  0xff   : > { %v445_v26 = vadd.f32 %v590_v22, %v444_v25 }
 0x100   : > { %v626_v28 = vpop.f32.mrf.mxu0 }
 0x101   : > { %v451_v32 = vmax.f32 %v445_v26, 0.0 }
 0x102   : > { %v447_v31 = vpop.f32.mrf.mxu0 }
 0x103   : > { %v448_v33 = vadd.f32 %v590_v22, %v447_v31  ;;  %v467_v36 = vsel %vm465_vm2, %v451_v32, -inf }
 0x104   : > { %v627_v34 = vpop.f32.mrf.mxu0 }
 0x105   : > { %v452_v35 = vmax.f32 %v448_v33, 0.0 }
 0x107   : > { %v468_v37 = vsel %vm466_vm3, %v452_v35, -inf }
 0x108   : > { %v469_v38 = vmax.f32 %v467_v36, %v468_v37 }
 0x10a   : > { %v470_v39 = vrot.slane %v469_v38, 4 }
 0x10c   : > { %v471_v40 = vmax.f32 %v469_v38, %v470_v39 }
 0x10e   : > { %v472_v41 = vrot.slane %v471_v40, 2 }
 0x110   : > { %v473_v42 = vmax.f32 %v471_v40, %v472_v41  ;;  %479 = sbr.rel (%p601_p12) target bundleno = 279 (0x117), region = 81 }
 0x112   : > { %v474_v43 = vrot.slane %v473_v42, 1 }
 0x114   : > { %v475_v44 = vmax.f32 %v473_v42, %v474_v43 }
 0x116   : > { %480 = vst [vmem:[%s847_s15] sm:$0x1] %v475_v44 }
 0x117 PF: > { %p602_p13 = scmp.le.s32.totalorder %s733_s17, 0 }
 0x119   : > { %484 = sbr.rel (%p602_p13) target bundleno = 290 (0x122), region = 85 }
 0x11e   : > { %v485_v45 = vld [vmem:[%s847_s15] sm:$0x1] }
 0x11f   : > { %v486_v46 = vmax.f32 %v485_v45, %v475_v44 }
 0x121   : > { %487 = vst [vmem:[%s847_s15] sm:$0x1] %v486_v46 }
 0x122 PF: > { %s14_s21 = sadd.s32 1, %s749_s21   ;;  %s892_s15 = smov %s729_s16 }
 0x123   : > { %p11_p0 = scmp.ge.s32.totalorder %s14_s21, 8   ;;  %s893_s16 = smov %s827_s26 }
 0x124   : > { %s894_s17 = smov %s741_s19  ;;  %s895_s18 = smov %s745_s20 }
 0x125   : > { %s896_s19 = smov %s899_s22  ;;  %s897_s20 = smov %s903_s23 }
 0x126   :  { %13 = sbr.rel (!%p11_p0) target bundleno = 4 (0x4), region = 129 }

</bundles_post_ra>
